<compile_context>
chip_gen: v6e
topology: v6e:2x2x1
jax: 0.10.0
libtpu: 0.0.40
codegen_flags: <defaults>
</compile_context>

<pallas_src>
import jax
import jax.numpy as jnp
from jax.experimental import pallas as pl
from jax.experimental.pallas import tpu as pltpu

LANES = 128            # vreg lane width
MAX_TILE_ROWS = 2048   # 2048 x 128 f32 = 1 MiB per input block


def _round_up(x, m):
    return ((x + m - 1) // m) * m


def _make_kernel(l0, rows, tile_rows, n_steps):
    """Build the kernel; L0 and all shape parameters are compile-time constants."""
    last_valid_rows = rows - (n_steps - 1) * tile_rows   # rows in the final block
    ragged = last_valid_rows != tile_rows                # final block is partial?

    def kernel(yp_ref, g_ref, yt_ref, out_ref, acc_ref):
        step = pl.program_id(0)

        @pl.when(step == 0)
        def _():
            acc_ref[...] = jnp.zeros_like(acc_ref)

        yp = yp_ref[...].astype(jnp.float32)
        yt = yt_ref[...].astype(jnp.float32)
        g = g_ref[...].astype(jnp.float32)
        d = yp - yt
        # Folded per-element contribution: g * (criterion - L0).
        contrib = g * (d * d - jnp.float32(l0))

        def accumulate(x):
            # (tile_rows, 128) -> (tile_rows//8, 8, 128) is a layout no-op;
            # summing axis 0 is pure element-wise VPU adds into a single
            # (8, 128) accumulator tile (4 KiB).  No per-step XLU reduce.
            acc_ref[...] += x.reshape(-1, 8, LANES).sum(axis=0)

        if not ragged:
            accumulate(contrib)
        else:
            is_last = step == n_steps - 1

            @pl.when(jnp.logical_not(is_last))
            def _():
                accumulate(contrib)

            @pl.when(is_last)
            def _():
                # The final block overruns the array: rows >= last_valid_rows
                # hold unspecified data -> select 0 for them (select, not
                # multiply, so NaN/inf garbage cannot leak in).
                row = jax.lax.broadcasted_iota(jnp.int32, contrib.shape, 0)
                accumulate(jnp.where(row < last_valid_rows, contrib, 0.0))

        @pl.when(step == n_steps - 1)
        def _():
            # Single epilogue cross-lane/sublane reduction of the 4 KiB tile.
            out_ref[...] = jnp.sum(acc_ref[...]).reshape(1, 1)

    return kernel


def penalized_uncertainty_loss(y_pred, g, y_true, L0, *, max_tile_rows=MAX_TILE_ROWS):
    """mean(g * (y_pred - y_true)**2 + (1 - g) * L0) via a Pallas TPU kernel.

    L0 must be a static Python scalar (as in the PyTorch module, where it is a
    plain attribute updated under torch.no_grad); it is folded into the kernel
    as a compile-time constant.
    """
    assert y_pred.shape == g.shape == y_true.shape
    L0 = float(L0)
    total = int(y_pred.size)

    # Flatten: a reshape of a contiguous row-major array is free (no HBM copy).
    yp, gg, yt = y_pred.reshape(-1), g.reshape(-1), y_true.reshape(-1)

    # Lane alignment.  Only if the element count is not a multiple of 128 do we
    # pad (< 128 zeros; zero-padding contributes exactly 0 to the folded sum).
    # Row-level raggedness is handled in-kernel and never pads.
    rem = total % LANES
    if rem:
        pad = LANES - rem
        yp = jnp.pad(yp, (0, pad))
        gg = jnp.pad(gg, (0, pad))
        yt = jnp.pad(yt, (0, pad))
    rows = yp.shape[0] // LANES

    yp = yp.reshape(rows, LANES)
    gg = gg.reshape(rows, LANES)
    yt = yt.reshape(rows, LANES)

    # Sublane granularity: 8 rows for 32-bit inputs, 16 for 16-bit (bf16 packing).
    min_itemsize = min(jnp.dtype(a.dtype).itemsize for a in (yp, gg, yt))
    sub = {4: 8, 2: 16, 1: 32}.get(min_itemsize, 8)

    tile_rows = min(_round_up(max_tile_rows, sub), _round_up(rows, sub))
    n_steps = pl.cdiv(rows, tile_rows)

    tile_spec = pl.BlockSpec((tile_rows, LANES), lambda k: (k, 0))

    # TODO(synk): on v7x (2 TensorCores/chip) a leading CORE_PARALLEL grid axis
    #             (or pl.core_map over a 2-core mesh) would shard this HBM
    #             stream across both cores; omitted here to keep a single,
    #             generation-safe codegen path.
    partial = pl.pallas_call(
        _make_kernel(L0, rows, tile_rows, n_steps),
        out_shape=jax.ShapeDtypeStruct((1, 1), jnp.float32),
        grid_spec=pltpu.PrefetchScalarGridSpec(
            num_scalar_prefetch=0,
            grid=(n_steps,),
            in_specs=[tile_spec, tile_spec, tile_spec],   # y_pred, g, y_true
            out_specs=pl.BlockSpec((1, 1), lambda k: (0, 0)),
            scratch_shapes=[pltpu.VMEM((8, LANES), jnp.float32)],
        ),
        compiler_params=pltpu.CompilerParams(
            dimension_semantics=("arbitrary",),
        ),
    )(yp, gg, yt)

    # mean(g*(crit - L0)) + L0  ==  mean(g*crit + (1-g)*L0)
    return partial[0, 0] / jnp.float32(total) + jnp.float32(L0)


if __name__ == "__main__":
    key = jax.random.PRNGKey(0)
    k1, k2, k3 = jax.random.split(key, 3)

    # NCHW-shaped inputs, consistent with a segmentation-style use of the loss.
    B, C, H, W = 2, 4, 16, 16
    y_pred = jax.random.normal(k1, (B, C, H, W), dtype=jnp.float32)
    y_true = jax.random.normal(k2, (B, C, H, W), dtype=jnp.float32)
    g = jax.nn.sigmoid(jax.random.normal(k3, (B, C, H, W), dtype=jnp.float32))
    L0 = 0.5  # module's def_loss (static scalar)

    out = penalized_uncertainty_loss(y_pred, g, y_true, L0)
    out = jax.block_until_ready(out)
    ref = jnp.mean(g * (y_pred - y_true) ** 2 + (1.0 - g) * L0)
    assert jnp.allclose(out, ref, atol=1e-5, rtol=1e-5), (out, ref)

    # Second check: multi-step grid with a ragged, in-kernel-masked final block
    # (17 rows of 128, tile of 8 rows -> 3 steps, last block has 1 valid row).
    B2, C2, H2, W2 = 2, 4, 17, 16
    yp2 = jax.random.normal(k1, (B2, C2, H2, W2), dtype=jnp.float32)
    yt2 = jax.random.normal(k2, (B2, C2, H2, W2), dtype=jnp.float32)
    g2 = jax.nn.sigmoid(jax.random.normal(k3, (B2, C2, H2, W2), dtype=jnp.float32))
    out2 = penalized_uncertainty_loss(yp2, g2, yt2, L0, max_tile_rows=8)
    out2 = jax.block_until_ready(out2)
    ref2 = jnp.mean(g2 * (yp2 - yt2) ** 2 + (1.0 - g2) * L0)
    assert jnp.allclose(out2, ref2, atol=1e-5, rtol=1e-5), (out2, ref2)

    print("KERNEL_OK")
</pallas_src>

<mosaic_0001>
module attributes {stable_mosaic.version = 11 : i64} {
  func.func @kernel(%arg0: i32, %arg1: memref<16x128xf32, #tpu.memory_space<vmem>>, %arg2: memref<16x128xf32, #tpu.memory_space<vmem>>, %arg3: memref<16x128xf32, #tpu.memory_space<vmem>>, %arg4: memref<1x1xf32, #tpu.memory_space<vmem>>, %arg5: memref<8x128xf32, #tpu.memory_space<vmem>>) attributes {dimension_semantics = [#tpu.dimension_semantics<arbitrary>], iteration_bounds = array<i64: 1>, scalar_prefetch = 0 : i64, scratch_operands = 1 : i64, tpu.core_type = #tpu.core_type<tc>, window_params = [{transform_indices = @transform_0, window_bounds = array<i64: 16, 128>}, {transform_indices = @transform_1, window_bounds = array<i64: 16, 128>}, {transform_indices = @transform_2, window_bounds = array<i64: 16, 128>}, {pipeline_mode = #tpu.pipeline_mode<synchronous>, transform_indices = @transform_3, window_bounds = array<i64: 1, 1>}]} {
    %c0_i32 = arith.constant 0 : i32
    %0 = arith.cmpi eq, %arg0, %c0_i32 : i32
    %1 = arith.extui %0 : i1 to i32
    %c0_i32_0 = arith.constant 0 : i32
    %2 = arith.cmpi ne, %1, %c0_i32_0 : i32
    scf.if %2 {
      %cst_13 = arith.constant 0.000000e+00 : f32
      %19 = vector.broadcast %cst_13 : f32 to vector<8x128xf32>
      %c0_14 = arith.constant 0 : index
      %c0_15 = arith.constant 0 : index
      %20 = vector.load %arg5[%c0_14, %c0_15] : memref<8x128xf32, #tpu.memory_space<vmem>>, vector<8x128xf32>
      tpu.vector_store %arg5[%c0_14, %c0_15], %19 {strides = array<i32>} : memref<8x128xf32, #tpu.memory_space<vmem>>, vector<8x128xf32>,
    } else {
    }
    %c0 = arith.constant 0 : index
    %c0_1 = arith.constant 0 : index
    %3 = vector.load %arg1[%c0, %c0_1] : memref<16x128xf32, #tpu.memory_space<vmem>>, vector<16x128xf32>
    %c0_2 = arith.constant 0 : index
    %c0_3 = arith.constant 0 : index
    %4 = vector.load %arg3[%c0_2, %c0_3] : memref<16x128xf32, #tpu.memory_space<vmem>>, vector<16x128xf32>
    %c0_4 = arith.constant 0 : index
    %c0_5 = arith.constant 0 : index
    %5 = vector.load %arg2[%c0_4, %c0_5] : memref<16x128xf32, #tpu.memory_space<vmem>>, vector<16x128xf32>
    %6 = arith.subf %3, %4 : vector<16x128xf32>
    %7 = arith.mulf %6, %6 : vector<16x128xf32>
    %cst = arith.constant 5.000000e-01 : f32
    %8 = vector.broadcast %cst : f32 to vector<16x128xf32>
    %9 = arith.subf %7, %8 : vector<16x128xf32>
    %10 = arith.mulf %5, %9 : vector<16x128xf32>
    %c0_6 = arith.constant 0 : index
    %c0_7 = arith.constant 0 : index
    %11 = vector.load %arg5[%c0_6, %c0_7] : memref<8x128xf32, #tpu.memory_space<vmem>>, vector<8x128xf32>
    %12 = vector.shape_cast %10 : vector<16x128xf32> to vector<2x8x128xf32>
    %cst_8 = arith.constant dense<0.000000e+00> : vector<8x128xf32>
    %13 = vector.multi_reduction <add>, %12, %cst_8 [0] : vector<2x8x128xf32> to vector<8x128xf32>
    %14 = arith.addf %11, %13 : vector<8x128xf32>
    %c0_9 = arith.constant 0 : index
    %c0_10 = arith.constant 0 : index
    %15 = vector.load %arg5[%c0_9, %c0_10] : memref<8x128xf32, #tpu.memory_space<vmem>>, vector<8x128xf32>
    tpu.vector_store %arg5[%c0_9, %c0_10], %14 {strides = array<i32>} : memref<8x128xf32, #tpu.memory_space<vmem>>, vector<8x128xf32>,
    %c0_i32_11 = arith.constant 0 : i32
    %16 = arith.cmpi eq, %arg0, %c0_i32_11 : i32
    %17 = arith.extui %16 : i1 to i32
    %c0_i32_12 = arith.constant 0 : i32
    %18 = arith.cmpi ne, %17, %c0_i32_12 : i32
    scf.if %18 {
      %c0_13 = arith.constant 0 : index
      %c0_14 = arith.constant 0 : index
      %19 = vector.load %arg5[%c0_13, %c0_14] : memref<8x128xf32, #tpu.memory_space<vmem>>, vector<8x128xf32>
      %20 = vector.shape_cast %19 : vector<8x128xf32> to vector<1x8x128xf32>
      %cst_15 = arith.constant dense<0.000000e+00> : vector<1xf32>
      %21 = vector.multi_reduction <add>, %20, %cst_15 [1, 2] : vector<1x8x128xf32> to vector<1xf32>
      %22 = vector.shape_cast %21 : vector<1xf32> to vector<1x1x1xf32>
      %23 = vector.extract %22[0, 0, 0] : f32 from vector<1x1x1xf32>
      %24 = vector.broadcast %23 : f32 to vector<1x1xf32>
      %c0_16 = arith.constant 0 : index
      %c0_17 = arith.constant 0 : index
      %25 = vector.load %arg4[%c0_16, %c0_17] : memref<1x1xf32, #tpu.memory_space<vmem>>, vector<1x1xf32>
      tpu.vector_store %arg4[%c0_16, %c0_17], %24 {strides = array<i32>} : memref<1x1xf32, #tpu.memory_space<vmem>>, vector<1x1xf32>,
    } else {
    }
    return
  }
  func.func @transform_0(%arg0: i32) -> (i32, i32) {
    %c0_i32 = arith.constant 0 : i32
    %c0_i32_0 = arith.constant 0 : i32
    return %arg0, %c0_i32 : i32, i32
  }
  func.func @transform_1(%arg0: i32) -> (i32, i32) {
    %c0_i32 = arith.constant 0 : i32
    %c0_i32_0 = arith.constant 0 : i32
    return %arg0, %c0_i32 : i32, i32
  }
  func.func @transform_2(%arg0: i32) -> (i32, i32) {
    %c0_i32 = arith.constant 0 : i32
    %c0_i32_0 = arith.constant 0 : i32
    return %arg0, %c0_i32 : i32, i32
  }
  func.func @transform_3(%arg0: i32) -> (i32, i32) {
    %c0_i32 = arith.constant 0 : i32
    %c0_i32_0 = arith.constant 0 : i32
    %c0_i32_1 = arith.constant 0 : i32
    return %c0_i32, %c0_i32_0 : i32, i32
  }
}

</mosaic_0001>

<bundles_post_ra>
// kernel: tpu_custom_call.1
= control target key start
LH: loop header
LB: loop body
LE: loop exit
PB: predicated region body
PF: predicated region fallthrough
CT: control target
= control target key end

     0   :  { %8 = vsyncpa [#allocation4], 0  ;;  %s245_s0 = inlined_call_operand.hbm [shape: f32[16,128], index: 0, kind: input, shape index: {}]   ;;  %s246_s1 = inlined_call_operand.hbm [shape: f32[16,128], index: 1, kind: input, shape index: {}]   ;;  %s247_s2 = inlined_call_operand.hbm [shape: f32[16,128], index: 2, kind: input, shape index: {}]   ;;  %s248_s3 = inlined_call_operand.hbm [shape: f32[1,1], index: 3, kind: output, shape index: {}]  }
   0x1   :  { %9 = vsyncpa [#allocation7], 0 }
   0x2   :  { %10 = vsyncpa [#allocation5], 0  ;;  %s207_s12 = smov [#allocation6]   ;;  %s208_s14 = smov [#allocation3]  }
   0x3   :  { %s28_s13 = sshll.u32 %s207_s12, 4  ;;  %s16_s15 = sshll.u32 %s208_s14, 4  ;;  %s29_s13 = int_to_ptr.vmem [resolvable:$true] %s28_s13  ;;  %s17_s15 = int_to_ptr.vmem [resolvable:$true] %s16_s15 }
   0x4   :  { %s129_s16 = scalar_lea.vmem %s29_s13, 256  ;;  %p134_p1 = scmp.lt.s32.totalorder %s29_s13, %s29_s13 }
   0x5   :  { %p130_p0 = scmp.ne.s32.totalorder %s29_s13, %s129_s16  ;;  %p135_p2 = scmp.lt.s32.totalorder %s129_s16, %s129_s16 }
   0x7   :  { %p136_p3 = por %p135_p2, %p134_p1 }
   0x9   :  { %p137_p4 = pnand %p136_p3, %p130_p0 }
   0xb   :  { %140 = shalt.err (!%p137_p4)
}
   0xc   :  { %s209_s17 = smov 128   ;;  %s210_s18 = smov 8  }
   0xd   :  { %34 = dma.hbm_to_vmem [thread:$0]  %s246_s1, 256, %s29_s13, [#allocation7], %s209_s17, %s209_s17, %s210_s18  }
   0xe   :  { %s149_s21 = scalar_lea.vmem %s17_s15, 256  ;;  %p154_p6 = scmp.lt.s32.totalorder %s17_s15, %s17_s15 }
   0xf   :  { %p150_p5 = scmp.ne.s32.totalorder %s17_s15, %s149_s21  ;;  %p155_p7 = scmp.lt.s32.totalorder %s149_s21, %s149_s21 }
  0x11   :  { %p156_p8 = por %p155_p7, %p154_p6 }
  0x13   :  { %p157_p9 = pnand %p156_p8, %p150_p5 }
  0x15   :  { %160 = shalt.err (!%p157_p9)
}
  0x16   :  { %22 = dma.hbm_to_vmem [thread:$0]  %s245_s0, 256, %s17_s15, [#allocation4], %s209_s17, %s209_s17, %s210_s18  }
  0x17   :  { %s211_s24 = smov [#allocation8]  }
  0x18   :  { %s40_s25 = sshll.u32 %s211_s24, 4  ;;  %s41_s25 = int_to_ptr.vmem [resolvable:$true] %s40_s25 }
  0x19   :  { %s169_s26 = scalar_lea.vmem %s41_s25, 256  ;;  %p174_p11 = scmp.lt.s32.totalorder %s41_s25, %s41_s25 }
  0x1a   :  { %p170_p10 = scmp.ne.s32.totalorder %s41_s25, %s169_s26  ;;  %p175_p12 = scmp.lt.s32.totalorder %s169_s26, %s169_s26 }
  0x1c   :  { %p176_p13 = por %p175_p12, %p174_p11 }
  0x1e   :  { %p177_p0 = pnand %p176_p13, %p170_p10 }
  0x20   :  { %180 = shalt.err (!%p177_p0)
}
  0x21   :  { %46 = dma.hbm_to_vmem [thread:$0]  %s247_s2, 256, %s41_s25, [#allocation7], %s209_s17, %s209_s17, %s210_s18  }
  0x22   :  { %201 = dma.done.wait [#allocation4], 256  }
  0x23   :  { %202 = vsyncadd [#allocation4], 4294967040 }
  0x24   :  { %203 = dma.done.wait [#allocation7], 512  }
  0x25   :  { %204 = vsyncadd [#allocation7], 4294966784  ;;  %v61_v0 = vld [vmem:[#allocation3] sm:$0xff]  ;;  %v62_v1 = vld [vmem:[#allocation3 + $0x8] sm:$0xff]  ;;  %s212_s0 = smov [#allocation9]   ;;  %vm93_vm0 = vcmask 0  }
  0x26   :  { %v63_v2 = vld [vmem:[#allocation8] sm:$0xff]  ;;  %v64_v3 = vld [vmem:[#allocation8 + $0x8] sm:$0xff]  ;;  %v65_v7 = vld [vmem:[#allocation6] sm:$0xff]  ;;  %s101_s2 = sshll.u32 %s212_s0, 4  ;;  %s102_s2 = int_to_ptr.vmem [resolvable:$true] %s101_s2 }
  0x27   :  { %v67_v4 = vsub.f32 %v61_v0, %v63_v2  ;;  %v68_v5 = vsub.f32 %v62_v1, %v64_v3  ;;  %v66_v9 = vld [vmem:[#allocation6 + $0x8] sm:$0xff]  ;;  %s181_s29 = scalar_lea.vmem %s102_s2, 16  ;;  %s185_s30 = scalar_lea.vmem %s102_s2, 32 }
  0x28   :  { %p182_p1 = scmp.ne.s32.totalorder %s102_s2, %s181_s29  ;;  %p186_p2 = scmp.lt.s32.totalorder %s102_s2, %s102_s2 }
  0x29   :  { %v69_v6 = vmul.f32 %v67_v4, %v67_v4  ;;  %v70_v8 = vmul.f32 %v68_v5, %v68_v5  ;;  %p187_p3 = scmp.lt.s32.totalorder %s185_s30, %s181_s29 }
  0x2b   :  { %v111_v10 = vadd.f32 -0.5, %v69_v6  ;;  %v112_v11 = vadd.f32 -0.5, %v70_v8  ;;  %p188_p4 = por %p187_p3, %p186_p2 }
  0x2d   :  { %v73_v12 = vmul.f32 %v111_v10, %v65_v7  ;;  %v74_v13 = vmul.f32 %v112_v11, %v66_v9  ;;  %p189_p5 = pnand %p188_p4, %p182_p1 }
  0x2f   :  { %v76_v14 = vadd.f32 %v74_v13, %v73_v12 }
  0x31   :  { %83 = vadd.xlane.f32.xlu0 %v76_v14 }
  0xba   :  { %v84_v15 = vpop.xlane.xlu0 %83 }
  0xbb   :  { %v85_v16 = vrot.slane %v84_v15, 4 }
  0xbd   :  { %v86_v17 = vadd.f32 %v85_v16, %v84_v15 }
  0xbf   :  { %v87_v18 = vrot.slane %v86_v17, 2 }
  0xc1   :  { %v88_v19 = vadd.f32 %v87_v18, %v86_v17 }
  0xc3   :  { %v89_v20 = vrot.slane %v88_v19, 1 }
  0xc5   :  { %v90_v21 = vadd.f32 %v89_v20, %v88_v19 }
  0xc7   :  { %113 = vpush %v90_v21 }
  0xf8   :  { %s114_s28 = spop %113 }
  0xf9   :  { %v92_v22 = vstv %s114_s28 }
  0xfa   :  { %94 = vst.msk [vmem:[#allocation9] sm:$0x1] %vm93_vm0, %v92_v22 }
  0xfb   :  { %192 = shalt.err (!%p189_p5)
}
  0xfc   :  { %104 = dma.vmem_to_hbm [thread:$0]  %s102_s2, 16, %s248_s3, [#allocation5]  }
  0xfd   :  { %205 = dma.done.wait [#allocation5], 16  }
  0xfe   :  { %206 = vsyncadd [#allocation5], 4294967280 }
  0xff   :  { %108 = vsyncpa [#allocation4], 1 }
 0x100   :  { %109 = vsyncpa [#allocation7], 1 }
 0x101   :  { %110 = vsyncpa [#allocation5], 1 }

</bundles_post_ra>
